<compile_context>
chip_gen: v7x
topology: tpu7x:2x2x1
jax: 0.10.0
libtpu: 0.0.40
codegen_flags: <defaults>
</compile_context>

<pallas_src>
import jax
import jax.numpy as jnp
from jax.experimental import pallas as pl
from jax.experimental.pallas import tpu as pltpu

F32 = jnp.float32
VMEM = pltpu.MemorySpace.VMEM

IN_DIM = 32          # in_dim
PROJ_DIM = 128       # projection_dim (module default) -> lane-dense outputs
TEMPERATURE = 0.5    # temperature (module default)
BN_EPS = 1e-5
NORM_EPS = 1e-12     # F.normalize eps


def _contrastive_kernel(x_ref, w1_ref, b1_ref, w2_ref, b2_ref,
                        hi_ref, ti_ref, he_ref, te_ref, loss_ref):
    # TODO(synk): Dropout(p=0.3) training-mode RNG masking not implemented (eval => identity).
    # TODO(synk): BatchNorm1d folded with eval-mode running stats (no batch-stat / running-stat update).

    b = hi_ref.shape[0]

    # projector (BN already folded into the Linears): Linear -> ReLU -> Linear
    x = x_ref[...]                                              # [4B, D_in], rows: [hi | he | ti | te]
    h = jnp.dot(x, w1_ref[...], preferred_element_type=F32) + b1_ref[...]
    h = jnp.maximum(h, 0.0)                                     # ReLU
    p = jnp.dot(h, w2_ref[...], preferred_element_type=F32) + b2_ref[...]   # [4B, P]

    # F.normalize(dim=-1): one EUP rsqrt, no divide.
    sumsq = jnp.sum(p * p, axis=-1, keepdims=True)
    z = p * jax.lax.rsqrt(jnp.maximum(sumsq, NORM_EPS * NORM_EPS))          # [4B, P]

    # Write the four projections directly (lane-dense, sublane-aligned slices).
    hi_ref[...] = z[0 * b:1 * b, :]
    he_ref[...] = z[1 * b:2 * b, :]
    ti_ref[...] = z[2 * b:3 * b, :]
    te_ref[...] = z[3 * b:4 * b, :]

    inv_t = 1.0 / TEMPERATURE
    n2 = 2 * b
    row = jax.lax.broadcasted_iota(jnp.int32, (n2, n2), 0)
    col = jax.lax.broadcasted_iota(jnp.int32, (n2, n2), 1)
    diag_pen = jnp.where(row == col, 1e9, 0.0)                  # eye * 1e9 subtraction

    def nt_xent(zc):
        # zc: [2B, P] contiguous slice, rows 0:B = z1, B:2B = z2, already unit-norm
        # (second F.normalize in the reference is identity here -> dropped).
        sim = jax.lax.dot_general(zc, zc, (((1,), (1,)), ((), ())),
                                  preferred_element_type=F32) * inv_t        # [2B, 2B]
        sim = sim - diag_pen
        m = jnp.max(sim, axis=-1, keepdims=True)
        lse = m + jnp.log(jnp.sum(jnp.exp(sim - m), axis=-1, keepdims=True))  # [2B, 1]
        # cross_entropy labels = cat([arange(B)+B, arange(B)]):
        # sim[i, label_i] == <z1_i, z2_i>/T for rows of both halves.
        pos = jnp.sum(zc[:b, :] * zc[b:, :], axis=-1, keepdims=True) * inv_t  # [B, 1]
        lse_sum = jnp.sum(lse, axis=0, keepdims=True)           # (1,1)
        pos_sum = jnp.sum(pos, axis=0, keepdims=True)           # (1,1)
        return (lse_sum - 2.0 * pos_sum) / n2                   # mean CE, (1,1)

    loss_h = nt_xent(z[0 * b:2 * b, :])    # (h_intra_proj, h_inter_proj)
    loss_t = nt_xent(z[2 * b:4 * b, :])    # (t_intra_proj, t_inter_proj)
    loss_ref[...] = (loss_h + loss_t) * 0.5


def contrastive_forward(params, h_intra, t_intra, h_inter, t_inter):
    b = h_intra.shape[0]
    proj_dim = params['w2'].shape[1]

    # Fold eval-mode BatchNorm into the Linear weights (wrapper-side, tiny).
    s1 = params['bn1_g'] * jax.lax.rsqrt(params['bn1_v'] + BN_EPS)      # (1, in_dim)
    w1f = params['w1'] * s1
    b1f = (params['b1'] - params['bn1_m']) * s1 + params['bn1_b']
    s2 = params['bn2_g'] * jax.lax.rsqrt(params['bn2_v'] + BN_EPS)      # (1, proj_dim)
    w2f = params['w2'] * s2
    b2f = (params['b2'] - params['bn2_m']) * s2 + params['bn2_b']

    # One stacked input, ordered so each NT-Xent pair is contiguous.
    x = jnp.concatenate([h_intra, h_inter, t_intra, t_inter], axis=0)   # [4B, in_dim]

    hi, ti, he, te, loss = pl.pallas_call(
        _contrastive_kernel,
        out_shape=(jax.ShapeDtypeStruct((b, proj_dim), F32),
                   jax.ShapeDtypeStruct((b, proj_dim), F32),
                   jax.ShapeDtypeStruct((b, proj_dim), F32),
                   jax.ShapeDtypeStruct((b, proj_dim), F32),
                   jax.ShapeDtypeStruct((1, 1), F32)),
        in_specs=[pl.BlockSpec(memory_space=VMEM)] * 5,
        out_specs=(pl.BlockSpec(memory_space=VMEM),) * 5,
    )(x, w1f, b1f, w2f, b2f)

    return (loss[0, 0], hi, ti, he, te)


# ----------------------------------------------------------------------------
# Deterministic synthetic parameters (shapes follow the module __init__).
# Linear weights stored as [in, out] for the x @ W matmul layout.
# ----------------------------------------------------------------------------
def init_params(key, in_dim=IN_DIM, proj_dim=PROJ_DIM):
    ks = jax.random.split(key, 8)

    def linear(k, fan_in, fan_out):
        kw, kb = jax.random.split(k)
        bound = 1.0 / jnp.sqrt(jnp.float32(fan_in))
        w = jax.random.uniform(kw, (fan_in, fan_out), F32, -bound, bound)
        bias = jax.random.uniform(kb, (1, fan_out), F32, -bound, bound)
        return w, bias

    w1, b1 = linear(ks[0], in_dim, in_dim)
    w2, b2 = linear(ks[1], in_dim, proj_dim)
    return dict(
        # projector[0] = Linear(in_dim, in_dim)
        w1=w1, b1=b1,
        # projector[1] = BatchNorm1d(in_dim)  (eval-mode running stats)
        bn1_g=jnp.ones((1, in_dim), F32),
        bn1_b=jnp.zeros((1, in_dim), F32),
        bn1_m=0.05 * jax.random.normal(ks[2], (1, in_dim), F32),
        bn1_v=1.0 + 0.1 * jax.random.uniform(ks[3], (1, in_dim), dtype=F32),
        # projector[3] = Linear(in_dim, projection_dim)
        w2=w2, b2=b2,
        # projector[4] = BatchNorm1d(projection_dim)
        bn2_g=jnp.ones((1, proj_dim), F32),
        bn2_b=jnp.zeros((1, proj_dim), F32),
        bn2_m=0.05 * jax.random.normal(ks[4], (1, proj_dim), F32),
        bn2_v=1.0 + 0.1 * jax.random.uniform(ks[5], (1, proj_dim), dtype=F32),
    )


if __name__ == "__main__":
    key = jax.random.PRNGKey(0)
    kp, k1, k2, k3, k4 = jax.random.split(key, 5)
    params = init_params(kp)

    B = 8  # per-branch batch size (multiple of 8 -> all row slices tile-aligned)
    h_intra = jax.random.normal(k1, (B, IN_DIM), F32)
    t_intra = jax.random.normal(k2, (B, IN_DIM), F32)
    h_inter = jax.random.normal(k3, (B, IN_DIM), F32)
    t_inter = jax.random.normal(k4, (B, IN_DIM), F32)

    fwd = jax.jit(contrastive_forward)
    out = fwd(params, h_intra, t_intra, h_inter, t_inter)
    jax.block_until_ready(out)
    print("KERNEL_OK")
</pallas_src>

<mosaic_0001>
module attributes {stable_mosaic.version = 11 : i64} {
  func.func @_contrastive_kernel(%arg0: memref<32x32xf32, #tpu.memory_space<vmem>>, %arg1: memref<32x32xf32, #tpu.memory_space<vmem>>, %arg2: memref<1x32xf32, #tpu.memory_space<vmem>>, %arg3: memref<32x128xf32, #tpu.memory_space<vmem>>, %arg4: memref<1x128xf32, #tpu.memory_space<vmem>>, %arg5: memref<8x128xf32, #tpu.memory_space<vmem>>, %arg6: memref<8x128xf32, #tpu.memory_space<vmem>>, %arg7: memref<8x128xf32, #tpu.memory_space<vmem>>, %arg8: memref<8x128xf32, #tpu.memory_space<vmem>>, %arg9: memref<1x1xf32, #tpu.memory_space<vmem>>) attributes {dimension_semantics = [], scalar_prefetch = 0 : i64, scratch_operands = 0 : i64, tpu.core_type = #tpu.core_type<tc>} {
    %c0 = arith.constant 0 : index
    %c0_0 = arith.constant 0 : index
    %0 = vector.load %arg0[%c0, %c0_0] : memref<32x32xf32, #tpu.memory_space<vmem>>, vector<32x32xf32>
    %c0_1 = arith.constant 0 : index
    %c0_2 = arith.constant 0 : index
    %1 = vector.load %arg1[%c0_1, %c0_2] : memref<32x32xf32, #tpu.memory_space<vmem>>, vector<32x32xf32>
    %cst = arith.constant dense<0.000000e+00> : vector<32x32xf32>
    %2 = tpu.matmul %0, %1, %cst {dimension_numbers = #tpu.dot_dimension_numbers<[1], [0], [0], [1], [0, 0, 1, 1], [], []>} : vector<32x32xf32>, vector<32x32xf32>, vector<32x32xf32> -> vector<32x32xf32>
    %c0_3 = arith.constant 0 : index
    %c0_4 = arith.constant 0 : index
    %3 = vector.load %arg2[%c0_3, %c0_4] : memref<1x32xf32, #tpu.memory_space<vmem>>, vector<1x32xf32>
    %4 = vector.broadcast %3 : vector<1x32xf32> to vector<32x32xf32>
    %5 = arith.addf %2, %4 : vector<32x32xf32>
    %cst_5 = arith.constant 0.000000e+00 : f32
    %6 = vector.broadcast %cst_5 : f32 to vector<32x32xf32>
    %7 = arith.maximumf %5, %6 : vector<32x32xf32>
    %c0_6 = arith.constant 0 : index
    %c0_7 = arith.constant 0 : index
    %8 = vector.load %arg3[%c0_6, %c0_7] : memref<32x128xf32, #tpu.memory_space<vmem>>, vector<32x128xf32>
    %cst_8 = arith.constant dense<0.000000e+00> : vector<32x128xf32>
    %9 = tpu.matmul %7, %8, %cst_8 {dimension_numbers = #tpu.dot_dimension_numbers<[1], [0], [0], [1], [0, 0, 1, 1], [], []>} : vector<32x32xf32>, vector<32x128xf32>, vector<32x128xf32> -> vector<32x128xf32>
    %c0_9 = arith.constant 0 : index
    %c0_10 = arith.constant 0 : index
    %10 = vector.load %arg4[%c0_9, %c0_10] : memref<1x128xf32, #tpu.memory_space<vmem>>, vector<1x128xf32>
    %11 = vector.broadcast %10 : vector<1x128xf32> to vector<32x128xf32>
    %12 = arith.addf %9, %11 : vector<32x128xf32>
    %13 = arith.mulf %12, %12 : vector<32x128xf32>
    %cst_11 = arith.constant dense<0.000000e+00> : vector<32xf32>
    %14 = vector.multi_reduction <add>, %13, %cst_11 [1] : vector<32x128xf32> to vector<32xf32>
    %15 = vector.shape_cast %14 : vector<32xf32> to vector<32x1xf32>
    %cst_12 = arith.constant 1.000000e-24 : f32
    %16 = vector.broadcast %cst_12 : f32 to vector<32x1xf32>
    %17 = arith.maximumf %15, %16 : vector<32x1xf32>
    %18 = math.rsqrt %17 : vector<32x1xf32>
    %19 = vector.broadcast %18 : vector<32x1xf32> to vector<32x128xf32>
    %20 = arith.mulf %12, %19 : vector<32x128xf32>
    %21 = vector.extract_strided_slice %20 {offsets = [0, 0], sizes = [8, 128], strides = [1, 1]} : vector<32x128xf32> to vector<8x128xf32>
    %c0_13 = arith.constant 0 : index
    %c0_14 = arith.constant 0 : index
    %22 = vector.load %arg5[%c0_13, %c0_14] : memref<8x128xf32, #tpu.memory_space<vmem>>, vector<8x128xf32>
    tpu.vector_store %arg5[%c0_13, %c0_14], %21 {strides = array<i32>} : memref<8x128xf32, #tpu.memory_space<vmem>>, vector<8x128xf32>,
    %23 = vector.extract_strided_slice %20 {offsets = [8, 0], sizes = [8, 128], strides = [1, 1]} : vector<32x128xf32> to vector<8x128xf32>
    %c0_15 = arith.constant 0 : index
    %c0_16 = arith.constant 0 : index
    %24 = vector.load %arg7[%c0_15, %c0_16] : memref<8x128xf32, #tpu.memory_space<vmem>>, vector<8x128xf32>
    tpu.vector_store %arg7[%c0_15, %c0_16], %23 {strides = array<i32>} : memref<8x128xf32, #tpu.memory_space<vmem>>, vector<8x128xf32>,
    %25 = vector.extract_strided_slice %20 {offsets = [16, 0], sizes = [8, 128], strides = [1, 1]} : vector<32x128xf32> to vector<8x128xf32>
    %c0_17 = arith.constant 0 : index
    %c0_18 = arith.constant 0 : index
    %26 = vector.load %arg6[%c0_17, %c0_18] : memref<8x128xf32, #tpu.memory_space<vmem>>, vector<8x128xf32>
    tpu.vector_store %arg6[%c0_17, %c0_18], %25 {strides = array<i32>} : memref<8x128xf32, #tpu.memory_space<vmem>>, vector<8x128xf32>,
    %27 = vector.extract_strided_slice %20 {offsets = [24, 0], sizes = [8, 128], strides = [1, 1]} : vector<32x128xf32> to vector<8x128xf32>
    %c0_19 = arith.constant 0 : index
    %c0_20 = arith.constant 0 : index
    %28 = vector.load %arg8[%c0_19, %c0_20] : memref<8x128xf32, #tpu.memory_space<vmem>>, vector<8x128xf32>
    tpu.vector_store %arg8[%c0_19, %c0_20], %27 {strides = array<i32>} : memref<8x128xf32, #tpu.memory_space<vmem>>, vector<8x128xf32>,
    %29 = tpu.iota {dimensions = array<i32: 0>} : vector<16x16xi32>
    %30 = tpu.iota {dimensions = array<i32: 1>} : vector<16x16xi32>
    %31 = arith.cmpi eq, %29, %30 : vector<16x16xi32>
    %cst_21 = arith.constant 1.000000e+09 : f32
    %cst_22 = arith.constant 0.000000e+00 : f32
    %32 = vector.broadcast %cst_21 : f32 to vector<16x16xf32>
    %33 = vector.broadcast %cst_22 : f32 to vector<16x16xf32>
    %34 = arith.select %31, %32, %33 : vector<16x16xi1>, vector<16x16xf32>
    %35 = vector.extract_strided_slice %20 {offsets = [0, 0], sizes = [16, 128], strides = [1, 1]} : vector<32x128xf32> to vector<16x128xf32>
    %cst_23 = arith.constant dense<0.000000e+00> : vector<16x16xf32>
    %36 = tpu.matmul %35, %35, %cst_23 {dimension_numbers = #tpu.dot_dimension_numbers<[1], [1], [0], [0], [0, 0, 1, 0], [], []>} : vector<16x128xf32>, vector<16x128xf32>, vector<16x16xf32> -> vector<16x16xf32>
    %cst_24 = arith.constant 2.000000e+00 : f32
    %37 = vector.broadcast %cst_24 : f32 to vector<16x16xf32>
    %38 = arith.mulf %36, %37 : vector<16x16xf32>
    %39 = arith.subf %38, %34 : vector<16x16xf32>
    %cst_25 = arith.constant dense<0xFF800000> : vector<16xf32>
    %40 = vector.multi_reduction <maximumf>, %39, %cst_25 [1] : vector<16x16xf32> to vector<16xf32>
    %41 = vector.shape_cast %40 : vector<16xf32> to vector<16x1xf32>
    %42 = vector.broadcast %41 : vector<16x1xf32> to vector<16x16xf32>
    %43 = arith.subf %39, %42 : vector<16x16xf32>
    %44 = math.exp %43 : vector<16x16xf32>
    %cst_26 = arith.constant dense<0.000000e+00> : vector<16xf32>
    %45 = vector.multi_reduction <add>, %44, %cst_26 [1] : vector<16x16xf32> to vector<16xf32>
    %46 = vector.shape_cast %45 : vector<16xf32> to vector<16x1xf32>
    %47 = math.log %46 : vector<16x1xf32>
    %48 = arith.addf %41, %47 : vector<16x1xf32>
    %49 = vector.extract_strided_slice %35 {offsets = [0, 0], sizes = [8, 128], strides = [1, 1]} : vector<16x128xf32> to vector<8x128xf32>
    %50 = vector.extract_strided_slice %35 {offsets = [8, 0], sizes = [8, 128], strides = [1, 1]} : vector<16x128xf32> to vector<8x128xf32>
    %51 = arith.mulf %49, %50 : vector<8x128xf32>
    %cst_27 = arith.constant dense<0.000000e+00> : vector<8xf32>
    %52 = vector.multi_reduction <add>, %51, %cst_27 [1] : vector<8x128xf32> to vector<8xf32>
    %53 = vector.shape_cast %52 : vector<8xf32> to vector<8x1xf32>
    %cst_28 = arith.constant 2.000000e+00 : f32
    %54 = vector.broadcast %cst_28 : f32 to vector<8x1xf32>
    %55 = arith.mulf %53, %54 : vector<8x1xf32>
    %cst_29 = arith.constant dense<0.000000e+00> : vector<1xf32>
    %56 = vector.multi_reduction <add>, %48, %cst_29 [0] : vector<16x1xf32> to vector<1xf32>
    %57 = vector.shape_cast %56 : vector<1xf32> to vector<1x1xf32>
    %cst_30 = arith.constant dense<0.000000e+00> : vector<1xf32>
    %58 = vector.multi_reduction <add>, %55, %cst_30 [0] : vector<8x1xf32> to vector<1xf32>
    %59 = vector.shape_cast %58 : vector<1xf32> to vector<1x1xf32>
    %cst_31 = arith.constant 2.000000e+00 : f32
    %60 = vector.broadcast %cst_31 : f32 to vector<1x1xf32>
    %61 = arith.mulf %60, %59 : vector<1x1xf32>
    %62 = arith.subf %57, %61 : vector<1x1xf32>
    %cst_32 = arith.constant 1.600000e+01 : f32
    %63 = vector.broadcast %cst_32 : f32 to vector<1x1xf32>
    %64 = arith.divf %62, %63 : vector<1x1xf32>
    %65 = vector.extract_strided_slice %20 {offsets = [16, 0], sizes = [16, 128], strides = [1, 1]} : vector<32x128xf32> to vector<16x128xf32>
    %cst_33 = arith.constant dense<0.000000e+00> : vector<16x16xf32>
    %66 = tpu.matmul %65, %65, %cst_33 {dimension_numbers = #tpu.dot_dimension_numbers<[1], [1], [0], [0], [0, 0, 1, 0], [], []>} : vector<16x128xf32>, vector<16x128xf32>, vector<16x16xf32> -> vector<16x16xf32>
    %cst_34 = arith.constant 2.000000e+00 : f32
    %67 = vector.broadcast %cst_34 : f32 to vector<16x16xf32>
    %68 = arith.mulf %66, %67 : vector<16x16xf32>
    %69 = arith.subf %68, %34 : vector<16x16xf32>
    %cst_35 = arith.constant dense<0xFF800000> : vector<16xf32>
    %70 = vector.multi_reduction <maximumf>, %69, %cst_35 [1] : vector<16x16xf32> to vector<16xf32>
    %71 = vector.shape_cast %70 : vector<16xf32> to vector<16x1xf32>
    %72 = vector.broadcast %71 : vector<16x1xf32> to vector<16x16xf32>
    %73 = arith.subf %69, %72 : vector<16x16xf32>
    %74 = math.exp %73 : vector<16x16xf32>
    %cst_36 = arith.constant dense<0.000000e+00> : vector<16xf32>
    %75 = vector.multi_reduction <add>, %74, %cst_36 [1] : vector<16x16xf32> to vector<16xf32>
    %76 = vector.shape_cast %75 : vector<16xf32> to vector<16x1xf32>
    %77 = math.log %76 : vector<16x1xf32>
    %78 = arith.addf %71, %77 : vector<16x1xf32>
    %79 = vector.extract_strided_slice %65 {offsets = [0, 0], sizes = [8, 128], strides = [1, 1]} : vector<16x128xf32> to vector<8x128xf32>
    %80 = vector.extract_strided_slice %65 {offsets = [8, 0], sizes = [8, 128], strides = [1, 1]} : vector<16x128xf32> to vector<8x128xf32>
    %81 = arith.mulf %79, %80 : vector<8x128xf32>
    %cst_37 = arith.constant dense<0.000000e+00> : vector<8xf32>
    %82 = vector.multi_reduction <add>, %81, %cst_37 [1] : vector<8x128xf32> to vector<8xf32>
    %83 = vector.shape_cast %82 : vector<8xf32> to vector<8x1xf32>
    %cst_38 = arith.constant 2.000000e+00 : f32
    %84 = vector.broadcast %cst_38 : f32 to vector<8x1xf32>
    %85 = arith.mulf %83, %84 : vector<8x1xf32>
    %cst_39 = arith.constant dense<0.000000e+00> : vector<1xf32>
    %86 = vector.multi_reduction <add>, %78, %cst_39 [0] : vector<16x1xf32> to vector<1xf32>
    %87 = vector.shape_cast %86 : vector<1xf32> to vector<1x1xf32>
    %cst_40 = arith.constant dense<0.000000e+00> : vector<1xf32>
    %88 = vector.multi_reduction <add>, %85, %cst_40 [0] : vector<8x1xf32> to vector<1xf32>
    %89 = vector.shape_cast %88 : vector<1xf32> to vector<1x1xf32>
    %cst_41 = arith.constant 2.000000e+00 : f32
    %90 = vector.broadcast %cst_41 : f32 to vector<1x1xf32>
    %91 = arith.mulf %90, %89 : vector<1x1xf32>
    %92 = arith.subf %87, %91 : vector<1x1xf32>
    %cst_42 = arith.constant 1.600000e+01 : f32
    %93 = vector.broadcast %cst_42 : f32 to vector<1x1xf32>
    %94 = arith.divf %92, %93 : vector<1x1xf32>
    %95 = arith.addf %64, %94 : vector<1x1xf32>
    %cst_43 = arith.constant 5.000000e-01 : f32
    %96 = vector.broadcast %cst_43 : f32 to vector<1x1xf32>
    %97 = arith.mulf %95, %96 : vector<1x1xf32>
    %c0_44 = arith.constant 0 : index
    %c0_45 = arith.constant 0 : index
    %98 = vector.load %arg9[%c0_44, %c0_45] : memref<1x1xf32, #tpu.memory_space<vmem>>, vector<1x1xf32>
    tpu.vector_store %arg9[%c0_44, %c0_45], %97 {strides = array<i32>} : memref<1x1xf32, #tpu.memory_space<vmem>>, vector<1x1xf32>,
    return
  }
}

</mosaic_0001>

<bundles_post_ra>
// kernel: contrastive_forward.1
= control target key start
LH: loop header
LB: loop body
LE: loop exit
PB: predicated region body
PF: predicated region fallthrough
CT: control target
= control target key end

     0   :  { %15 = vsyncpa [#allocation3], 0  ;;  %s1049_s0 = inlined_call_operand.vmem [shape: f32[32,32], index: 0, kind: input, shape index: {}]   ;;  %s1050_s1 = inlined_call_operand.vmem [shape: f32[32,32], index: 1, kind: input, shape index: {}]   ;;  %s1051_s2 = inlined_call_operand.vmem [shape: f32[1,32], index: 2, kind: input, shape index: {}]   ;;  %s1052_s3 = inlined_call_operand.vmem [shape: f32[32,128], index: 3, kind: input, shape index: {}]   ;;  %s1053_s4 = inlined_call_operand.vmem [shape: f32[1,128], index: 4, kind: input, shape index: {}]   ;;  %s1054_s5 = inlined_call_operand.hbm [shape: f32[8,128], index: 5, kind: output, shape index: {0}]   ;;  %s1055_s6 = inlined_call_operand.hbm [shape: f32[8,128], index: 6, kind: output, shape index: {1}]   ;;  %s1056_s7 = inlined_call_operand.hbm [shape: f32[8,128], index: 7, kind: output, shape index: {2}]   ;;  %s1057_s8 = inlined_call_operand.hbm [shape: f32[8,128], index: 8, kind: output, shape index: {3}]   ;;  %s1058_s9 = inlined_call_operand.hbm [shape: f32[1,1], index: 9, kind: output, shape index: {4}]  }
   0x1   :  { %16 = vsyncpa [#allocation5], 0  ;;  %v32_v0 = vld [vmem:[%s1050_s1] sm:$0xff]  ;;  %v33_v1 = vld [vmem:[%s1050_s1 + $0x8] sm:$0xff]  ;;  %vm43_vm0 = vcmask 261120  }
   0x2   :  { %v34_v2 = vld [vmem:[%s1050_s1 + $0x10] sm:$0xff]  ;;  %v686_v3 = vpack.c.bf16 %v33_v1, %v32_v0  ;;  %v35_v4 = vld [vmem:[%s1050_s1 + $0x18] sm:$0xff]  ;;  %v28_v5 = vld [vmem:[%s1049_s0] sm:$0xff] }
   0x3   :  { %v690_v6 = vpack.c.bf16 %v35_v4, %v34_v2  ;;  %652 = vmatprep.mubr.msk.f32.mxu0 %vm43_vm0, %v28_v5  ;;  %v145_v7 = vld [vmem:[%s1052_s3] sm:$0xff]  ;;  %v146_v8 = vld [vmem:[%s1052_s3 + $0x8] sm:$0xff] }
   0x4   :  { %687 = vmatprep.subr.bf16.mxu0 %v686_v3 }
   0x5   :  { %17 = vsyncpa [#allocation8], 0  ;;  %689 = vmatpush3.bf16.msra.mxu0 %v686_v3  ;;  %v694_v9 = vpack.c.bf16 %v146_v8, %v145_v7  ;;  %v29_v10 = vld [vmem:[%s1049_s0 + $0x8] sm:$0xff]  ;;  %v30_v11 = vld [vmem:[%s1049_s0 + $0x10] sm:$0xff]  ;;  %v281_v62 = vlaneseq  ;;  %v856_v3 = vmov 0.0   ;;  %vm369_vm3 = vcmask 130048  }
   0x6   :  { %691 = vmatprep.subr.bf16.mxu0 %v690_v6  ;;  %v31_v12 = vld [vmem:[%s1049_s0 + $0x18] sm:$0xff]  ;;  %v147_v13 = vld [vmem:[%s1052_s3 + $0x10] sm:$0xff]  ;;  %v610_v16 = vld [vmem:[%s1051_s2] ss:$0 sm:$0xff]  ;;  %s858_s13 = smov [#allocation7]  }
   0x7   :  { %695 = vmatprep.subr.bf16.mxu1 %v694_v9  ;;  %v148_v14 = vld [vmem:[%s1052_s3 + $0x18] sm:$0xff]  ;;  %v615_v29 = vld [vmem:[%s1053_s4] ss:$0 sm:$0xff]  ;;  %v282_v63 = vshrl.u32 %v281_v62, 7  ;;  %v285_v0 = vand.u32 127, %v281_v62  ;;  %s857_s3 = smov [#allocation4]  }
   0x8   :  { %697 = vmatpush3.bf16.msra.mxu1 %v694_v9  ;;  %v698_v15 = vpack.c.bf16 %v148_v14, %v147_v13  ;;  %s558_s4 = sshll.u32 %s857_s3, 4  ;;  %s578_s14 = sshll.u32 %s858_s13, 4  ;;  %s559_s4 = int_to_ptr.vmem [resolvable:$true] %s558_s4  ;;  %s579_s14 = int_to_ptr.vmem [resolvable:$true] %s578_s14 }
   0x9   :  { %693 = vmatpush3.bf16.msra.mxu0 %v690_v6  ;;  %v283_v1 = vadd.s32 8, %v282_v63  ;;  %vm286_vm2 = vcmp.eq.s32.totalorder %v282_v63, %v285_v0  ;;  %s740_s15 = scalar_lea.vmem %s559_s4, 128  ;;  %p745_p1 = scmp.lt.s32.totalorder %s559_s4, %s559_s4 }
   0xa   :  { %699 = vmatprep.subr.bf16.mxu1 %v698_v15  ;;  %v288_v6 = vsel %vm286_vm2, 1e+09, %v856_v3  ;;  %p741_p0 = scmp.ne.s32.totalorder %s559_s4, %s740_s15  ;;  %p746_p2 = scmp.lt.s32.totalorder %s740_s15, %s740_s15 }
   0xb   :  { %vm287_vm1 = vcmp.eq.s32.totalorder %v283_v1, %v285_v0 }
   0xc   :  { %653 = vmatmul.mubr.msk.f32.vlgmr.msra.gmra.mrb[0].mxu0 %vm43_vm0, %v29_v10  ;;  %701 = vmatpush3.bf16.msra.mxu1 %v698_v15  ;;  %v289_v4 = vsel %vm287_vm1, 1e+09, %v856_v3  ;;  %p747_p3 = por %p746_p2, %p745_p1 }
   0xd   :  { %655 = vmatprep.mubr.msk.f32.mxu0 %vm43_vm0, %v30_v11 }
   0xe   :  { %p748_p4 = pnand %p747_p3, %p741_p0 }
  0x10   :  { %656 = vmatmul.mubr.msk.f32.gmra.mrb[2].mxu0 %vm43_vm0, %v31_v12 }
  0xdf   :  { %v654_v17 = vpop.f32.mrb[0].mxu0 }
  0xe0   :  { %v128_v18 = vadd.f32 %v654_v17, %v610_v16  ;;  %v122_v19 = vpop.f32.mrb[1].mxu0 }
  0xe1   :  { %v123_v20 = vadd.f32 %v610_v16, %v122_v19 }
  0xe2   :  { %v142_v23 = vmax.f32 %v128_v18, 0.0 }
  0xe3   :  { %v141_v21 = vmax.f32 %v123_v20, 0.0  ;;  %v657_v22 = vpop.f32.mrb[2].mxu0 }
  0xe4   :  { %v138_v24 = vadd.f32 %v657_v22, %v610_v16  ;;  %v132_v25 = vpop.f32.mrb[3].mxu0 }
  0xe5   :  { %v133_v26 = vadd.f32 %v610_v16, %v132_v25  ;;  %666 = vmatprep.mubr.msk.f32.mxu1 %vm43_vm0, %v141_v21 }
  0xe6   :  { %667 = vmatmul.mubr.msk.f32.vlgmr.msra.gmra.mrb[0].mxu1 %vm43_vm0, %v142_v23  ;;  %v144_v28 = vmax.f32 %v138_v24, 0.0 }
  0xe7   :  { %v143_v27 = vmax.f32 %v133_v26, 0.0 }
  0xe9   :  { %669 = vmatprep.mubr.msk.f32.mxu1 %vm43_vm0, %v143_v27 }
  0xea   :  { %670 = vmatmul.mubr.msk.f32.gmra.mrb[2].mxu1 %vm43_vm0, %v144_v28 }
 0x1b9   :  { %v668_v30 = vpop.f32.mrb[0].mxu1 }
 0x1ba   :  { %v234_v31 = vpop.f32.mrb[1].mxu1  ;;  %v240_v33 = vadd.f32 %v668_v30, %v615_v29 }
 0x1bb   :  { %v235_v32 = vadd.f32 %v615_v29, %v234_v31 }
 0x1bc   :  { %v254_v40 = vmul.f32 %v240_v33, %v240_v33 }
 0x1bd   :  { %v671_v34 = vpop.f32.mrb[2].mxu1  ;;  %v253_v35 = vmul.f32 %v235_v32, %v235_v32 }
 0x1be   :  { %v244_v36 = vpop.f32.mrb[3].mxu1  ;;  %v250_v38 = vadd.f32 %v671_v34, %v615_v29 }
 0x1bf   :  { %v245_v37 = vadd.f32 %v615_v29, %v244_v36  ;;  %257 = vadd.xlane.f32.xlu0 %v253_v35 }
 0x1c0   :  { %v256_v41 = vmul.f32 %v250_v38, %v250_v38 }
 0x1c1   :  { %v255_v39 = vmul.f32 %v245_v37, %v245_v37 }
 0x1c3   :  { %261 = vadd.xlane.f32.xlu1 %v255_v39  ;;  %259 = vadd.xlane.f32.xlu0 %v254_v40 }
 0x1c7   :  { %263 = vadd.xlane.f32.xlu1 %v256_v41 }
 0x24c   :  { %v258_v42 = vpop.xlane.xlu0 %257 }
 0x24d   :  { %v265_v43 = vmax.f32 %v258_v42, 1e-24 }
 0x24f   :  { %716 = vrsqrt.f32 %v265_v43 }
 0x250   :  { %v262_v44 = vpop.xlane.xlu1 %261  ;;  %v260_v45 = vpop.xlane.xlu0 %259 }
 0x251   :  { %v267_v46 = vmax.f32 %v262_v44, 1e-24  ;;  %v266_v47 = vmax.f32 %v260_v45, 1e-24 }
 0x253   :  { %718 = vrsqrt.f32 %v267_v46 }
 0x254   :  { %720 = vrsqrt.f32 %v266_v47  ;;  %v264_v48 = vpop.xlane.xlu1 %263 }
 0x255   :  { %v268_v49 = vmax.f32 %v264_v48, 1e-24 }
 0x257   :  { %722 = vrsqrt.f32 %v268_v49 }
 0x259   :  { %v717_v50 = vpop.eup %716 }
 0x25a   :  { %v273_v51 = vmul.f32 %v717_v50, %v235_v32 }
 0x25c   :  { %676 = vmatprep.mubr.f32.mxu0 %v273_v51  ;;  %277 = vst [vmem:[#allocation2] sm:$0xff] %v273_v51 }
 0x25d   :  { %v719_v52 = vpop.eup %718 }
 0x25e   :  { %v721_v53 = vpop.eup %720  ;;  %v275_v54 = vmul.f32 %v719_v52, %v245_v37 }
 0x25f   :  { %v274_v55 = vmul.f32 %v721_v53, %v240_v33 }
 0x260   :  { %683 = vmatprep.mubr.f32.mxu1 %v275_v54  ;;  %279 = vst [vmem:[#allocation4] sm:$0xff] %v275_v54 }
 0x261   :  { %v723_v56 = vpop.eup %722  ;;  %v702_v57 = vpack.c.bf16 %v274_v55, %v273_v51  ;;  %278 = vst [vmem:[#allocation6] sm:$0xff] %v274_v55  ;;  %v962_v58 = vmul.f32 %v274_v55, %v273_v51 }
 0x262   :  { %v276_v59 = vmul.f32 %v723_v56, %v250_v38 }
 0x263   :  { %703 = vmatprep.subr.bf16.mxu0 %v702_v57 }
 0x264   :  { %705 = vmatpush3.bf16.xpose.msra.mxu0 %v702_v57  ;;  %v706_v60 = vpack.c.bf16 %v276_v59, %v275_v54  ;;  %280 = vst [vmem:[#allocation7] sm:$0xff] %v276_v59  ;;  %v518_v61 = vmul.f32 %v276_v59, %v275_v54 }
 0x266   :  { %707 = vmatprep.subr.bf16.mxu1 %v706_v60 }
 0x267   :  { %709 = vmatpush3.bf16.xpose.msra.mxu1 %v706_v60 }
 0x26b   :  { %677 = vmatmul.mubr.f32.vlgmr.msra.gmra.mrb[4].mxu0 %v274_v55 }
 0x26e   :  { %684 = vmatmul.mubr.f32.vlgmr.msra.gmra.mrb[4].mxu1 %v276_v59 }
 0x33e   :  { %v678_v2 = vpop.f32.mrb[4].mxu0 }
 0x33f   :  { %v366_v5 = vmul.f32 2.0, %v678_v2  ;;  %v356_v7 = vpop.f32.mrb[5].mxu0 }
 0x340   :  { %v365_v8 = vmul.f32 2.0, %v356_v7 }
 0x341   :  { %v685_v9 = vpop.f32.mrb[4].mxu1  ;;  %v368_v10 = vsub.f32 %v366_v5, %v289_v4 }
 0x342   :  { %v367_v11 = vsub.f32 %v365_v8, %v288_v6  ;;  %v491_v12 = vmul.f32 2.0, %v685_v9  ;;  %v481_v13 = vpop.f32.mrb[5].mxu1 }
 0x343   :  { %v490_v14 = vmul.f32 2.0, %v481_v13  ;;  %v373_v15 = vsel %vm369_vm3, %v368_v10, -inf }
 0x344   :  { %374 = vmax.xlane.f32.xlu1 %v373_v15  ;;  %v370_v16 = vsel %vm369_vm3, %v367_v11, -inf  ;;  %v493_v17 = vsub.f32 %v491_v12, %v289_v4 }
 0x345   :  { %v492_v18 = vsub.f32 %v490_v14, %v288_v6  ;;  %371 = vmax.xlane.f32.xlu0 %v370_v16 }
 0x346   :  { %v497_v19 = vsel %vm369_vm3, %v493_v17, -inf }
 0x347   :  { %v494_v20 = vsel %vm369_vm3, %v492_v18, -inf }
 0x348   :  { %498 = vmax.xlane.f32.xlu1 %v497_v19 }
 0x349   :  { %495 = vmax.xlane.f32.xlu0 %v494_v20 }
 0x3d1   :  { %v968_v21 = vpop.xlane.xlu1 %374 }
 0x3d2   :  { %v377_v22 = vsub.f32 %v368_v10, %v968_v21  ;;  %v971_v23 = vpop.xlane.xlu0 %371 }
 0x3d3   :  { %v376_v24 = vsub.f32 %v367_v11, %v971_v23 }
 0x3d4   :  { %v380_v25 = vmul.f32 1.442695, %v377_v22 }
 0x3d5   :  { %v378_v26 = vmul.f32 1.442695, %v376_v24  ;;  %v974_v27 = vpop.xlane.xlu1 %498 }
 0x3d6   :  { %724 = vpow2.f32 %v380_v25  ;;  %v501_v28 = vsub.f32 %v493_v17, %v974_v27  ;;  %v977_v29 = vpop.xlane.xlu0 %495 }
 0x3d7   :  { %726 = vpow2.f32 %v378_v26  ;;  %v500_v30 = vsub.f32 %v492_v18, %v977_v29 }
 0x3d8   :  { %v504_v31 = vmul.f32 1.442695, %v501_v28 }
 0x3d9   :  { %v502_v32 = vmul.f32 1.442695, %v500_v30 }
 0x3da   :  { %728 = vpow2.f32 %v504_v31 }
 0x3db   :  { %730 = vpow2.f32 %v502_v32 }
 0x3e0   :  { %v725_v33 = vpop.eup %724 }
 0x3e1   :  { %v727_v34 = vpop.eup %726  ;;  %v385_v35 = vsel %vm369_vm3, %v725_v33, 0.0 }
 0x3e2   :  { %386 = vadd.xlane.f32.xlu1 %v385_v35  ;;  %v382_v36 = vsel %vm369_vm3, %v727_v34, 0.0 }
 0x3e3   :  { %383 = vadd.xlane.f32.xlu0 %v382_v36 }
 0x3e4   :  { %v729_v37 = vpop.eup %728 }
 0x3e5   :  { %v731_v38 = vpop.eup %730  ;;  %v509_v39 = vsel %vm369_vm3, %v729_v37, 0.0 }
 0x3e6   :  { %510 = vadd.xlane.f32.xlu1 %v509_v39  ;;  %v506_v40 = vsel %vm369_vm3, %v731_v38, 0.0 }
 0x3e7   :  { %507 = vadd.xlane.f32.xlu0 %v506_v40 }
 0x3ea   :  { %519 = vadd.xlane.f32.xlu1 %v518_v61 }
 0x3eb   :  { %395 = vadd.xlane.f32.xlu0 %v962_v58 }
 0x3ec   :  { %751 = shalt.err (!%p748_p4)
}
 0x3ed   :  { %s752_s18 = scalar_lea.hbm %s1055_s6, 128 }
 0x3ee   :  { %p753_p5 = scmp.ne.s32.totalorder %s1055_s6, %s752_s18  ;;  %p756_p6 = scmp.lt.u32.totalorder %s752_s18, %s1055_s6 }
 0x3f0   :  { %p758_p7 = pnand %p756_p6, %p753_p5 }
 0x3f2   :  { %761 = shalt.err (!%p758_p7)
}
 0x3f3   :  { %561 = dma.vmem_to_hbm [thread:$0]  %s559_s4, 128, %s1055_s6, [#allocation5]  }
 0x3f4   :  { %s762_s24 = scalar_lea.vmem %s579_s14, 128  ;;  %p767_p9 = scmp.lt.s32.totalorder %s579_s14, %s579_s14 }
 0x3f5   :  { %p763_p8 = scmp.ne.s32.totalorder %s579_s14, %s762_s24  ;;  %p768_p10 = scmp.lt.s32.totalorder %s762_s24, %s762_s24 }
 0x3f7   :  { %p769_p11 = por %p768_p10, %p767_p9 }
 0x3f9   :  { %p770_p12 = pnand %p769_p11, %p763_p8 }
 0x3fb   :  { %773 = shalt.err (!%p770_p12)
}
 0x3fc   :  { %s774_s27 = scalar_lea.hbm %s1057_s8, 128 }
 0x3fd   :  { %p775_p13 = scmp.ne.s32.totalorder %s1057_s8, %s774_s27  ;;  %p778_p0 = scmp.lt.u32.totalorder %s774_s27, %s1057_s8 }
 0x3ff   :  { %p780_p1 = pnand %p778_p0, %p775_p13 }
 0x401   :  { %783 = shalt.err (!%p780_p1)
}
 0x402   :  { %581 = dma.vmem_to_hbm [thread:$0]  %s579_s14, 128, %s1057_s8, [#allocation8]  }
 0x403   :  { %s859_s12 = smov [#allocation2]   ;;  %s860_s2 = smov [#allocation6]  }
 0x404   :  { %s548_s0 = sshll.u32 %s859_s12, 4  ;;  %s568_s3 = sshll.u32 %s860_s2, 4  ;;  %s549_s0 = int_to_ptr.vmem [resolvable:$true] %s548_s0  ;;  %s569_s3 = int_to_ptr.vmem [resolvable:$true] %s568_s3 }
 0x405   :  { %s784_s4 = scalar_lea.vmem %s549_s0, 128  ;;  %p789_p3 = scmp.lt.s32.totalorder %s549_s0, %s549_s0 }
 0x406   :  { %p785_p2 = scmp.ne.s32.totalorder %s549_s0, %s784_s4  ;;  %p790_p4 = scmp.lt.s32.totalorder %s784_s4, %s784_s4 }
 0x408   :  { %p791_p5 = por %p790_p4, %p789_p3 }
 0x40a   :  { %p792_p6 = pnand %p791_p5, %p785_p2 }
 0x40c   :  { %795 = shalt.err (!%p792_p6)
}
 0x40d   :  { %s796_s16 = scalar_lea.hbm %s1054_s5, 128 }
 0x40e   :  { %p797_p7 = scmp.ne.s32.totalorder %s1054_s5, %s796_s16  ;;  %p800_p8 = scmp.lt.u32.totalorder %s796_s16, %s1054_s5 }
 0x410   :  { %p802_p9 = pnand %p800_p8, %p797_p7 }
 0x412   :  { %805 = shalt.err (!%p802_p9)
}
 0x413   :  { %551 = dma.vmem_to_hbm [thread:$0]  %s549_s0, 128, %s1054_s5, [#allocation3]  }
 0x414   :  { %s806_s21 = scalar_lea.vmem %s569_s3, 128  ;;  %p811_p11 = scmp.lt.s32.totalorder %s569_s3, %s569_s3 }
 0x415   :  { %p807_p10 = scmp.ne.s32.totalorder %s569_s3, %s806_s21  ;;  %p812_p12 = scmp.lt.s32.totalorder %s806_s21, %s806_s21 }
 0x417   :  { %p813_p13 = por %p812_p12, %p811_p11 }
 0x419   :  { %p814_p0 = pnand %p813_p13, %p807_p10 }
 0x41b   :  { %817 = shalt.err (!%p814_p0)
}
 0x41c   :  { %s818_s23 = scalar_lea.hbm %s1056_s7, 128 }
 0x41d   :  { %p819_p1 = scmp.ne.s32.totalorder %s1056_s7, %s818_s23  ;;  %p822_p2 = scmp.lt.u32.totalorder %s818_s23, %s1056_s7 }
 0x41f   :  { %p824_p3 = pnand %p822_p2, %p819_p1 }
 0x421   :  { %827 = shalt.err (!%p824_p3)
}
 0x422   :  { %571 = dma.vmem_to_hbm [thread:$0]  %s569_s3, 128, %s1056_s7, [#allocation5]   ;;  %vm540_vm4 = vcmask 0  }
 0x423   :  { %s861_s7 = smov [#allocation9]  }
 0x424   :  { %s588_s29 = sshll.u32 %s861_s7, 4  ;;  %s589_s29 = int_to_ptr.vmem [resolvable:$true] %s588_s29 }
 0x425   :  { %s828_s30 = scalar_lea.vmem %s589_s29, 16  ;;  %s832_s10 = scalar_lea.vmem %s589_s29, 32 }
 0x426   :  { %p829_p4 = scmp.ne.s32.totalorder %s589_s29, %s828_s30  ;;  %p833_p5 = scmp.lt.s32.totalorder %s589_s29, %s589_s29 }
 0x427   :  { %p834_p6 = scmp.lt.s32.totalorder %s832_s10, %s828_s30 }
 0x429   :  { %p835_p7 = por %p834_p6, %p833_p5 }
 0x42b   :  { %p836_p8 = pnand %p835_p7, %p829_p4 }
 0x46f   :  { %v387_v41 = vpop.xlane.xlu1 %386 }
 0x470   :  { %732 = vlog2.f32 %v387_v41  ;;  %v384_v42 = vpop.xlane.xlu0 %383 }
 0x471   :  { %734 = vlog2.f32 %v384_v42 }
 0x473   :  { %v511_v43 = vpop.xlane.xlu1 %510 }
 0x474   :  { %736 = vlog2.f32 %v511_v43  ;;  %v508_v44 = vpop.xlane.xlu0 %507 }
 0x475   :  { %738 = vlog2.f32 %v508_v44 }
 0x477   :  { %v520_v45 = vpop.xlane.xlu1 %519 }
 0x478   :  { %v521_v46 = vmul.f32 2.0, %v520_v45  ;;  %v396_v47 = vpop.xlane.xlu0 %395 }
 0x479   :  { %v397_v48 = vmul.f32 2.0, %v396_v47 }
 0x47a   :  { %v733_v49 = vpop.eup %732  ;;  %v529_v50 = vrot.slane %v521_v46, 4 }
 0x47b   :  { %v735_v51 = vpop.eup %734  ;;  %v391_v52 = vmul.f32 0.6931472, %v733_v49  ;;  %v405_v53 = vrot.slane %v397_v48, 4 }
 0x47c   :  { %v389_v54 = vmul.f32 0.6931472, %v735_v51  ;;  %v530_v55 = vadd.f32 %v529_v50, %v521_v46 }
 0x47d   :  { %v393_v56 = vadd.f32 %v391_v52, %v968_v21  ;;  %v406_v57 = vadd.f32 %v405_v53, %v397_v48 }
 0x47e   :  { %v737_v58 = vpop.eup %736  ;;  %v392_v59 = vadd.f32 %v389_v54, %v971_v23  ;;  %v531_v1 = vrot.slane %v530_v55, 2 }
 0x47f   :  { %v739_v60 = vpop.eup %738  ;;  %v515_v61 = vmul.f32 0.6931472, %v737_v58  ;;  %v407_v62 = vrot.slane %v406_v57, 2 }
 0x480   :  { %v398_v63 = vadd.f32 %v393_v56, %v392_v59  ;;  %v513_v0 = vmul.f32 0.6931472, %v739_v60  ;;  %v532_v8 = vadd.f32 %v531_v1, %v530_v55 }
 0x481   :  { %v517_v2 = vadd.f32 %v515_v61, %v974_v27  ;;  %v408_v5 = vadd.f32 %v407_v62, %v406_v57 }
 0x482   :  { %v399_v3 = vrot.slane %v398_v63, 4  ;;  %v516_v4 = vadd.f32 %v513_v0, %v977_v29  ;;  %v533_v13 = vrot.slane %v532_v8, 1 }
 0x483   :  { %v409_v11 = vrot.slane %v408_v5, 1 }
 0x484   :  { %v400_v6 = vadd.f32 %v399_v3, %v398_v63  ;;  %v522_v7 = vadd.f32 %v517_v2, %v516_v4  ;;  %v534_v18 = vadd.f32 %v533_v13, %v532_v8 }
 0x485   :  { %v410_v16 = vadd.f32 %v409_v11, %v408_v5 }
 0x486   :  { %v401_v9 = vrot.slane %v400_v6, 2  ;;  %v523_v10 = vrot.slane %v522_v7, 4  ;;  %v535_v23 = vmul.f32 2.0, %v534_v18 }
 0x487   :  { %v411_v21 = vmul.f32 2.0, %v410_v16 }
 0x488   :  { %v524_v12 = vadd.f32 %v523_v10, %v522_v7  ;;  %v402_v14 = vadd.f32 %v401_v9, %v400_v6 }
 0x48a   :  { %v525_v15 = vrot.slane %v524_v12, 2  ;;  %v403_v17 = vrot.slane %v402_v14, 1 }
 0x48c   :  { %v404_v19 = vadd.f32 %v403_v17, %v402_v14  ;;  %v526_v20 = vadd.f32 %v525_v15, %v524_v12 }
 0x48e   :  { %v527_v22 = vrot.slane %v526_v20, 1  ;;  %v412_v24 = vsub.f32 %v404_v19, %v411_v21 }
 0x490   :  { %v528_v25 = vadd.f32 %v527_v22, %v526_v20  ;;  %v414_v27 = vmul.f32 0.0625, %v412_v24 }
 0x492   :  { %v536_v26 = vsub.f32 %v528_v25, %v535_v23 }
 0x494   :  { %v537_v28 = vmul.f32 0.0625, %v536_v26 }
 0x496   :  { %v538_v29 = vadd.f32 %v537_v28, %v414_v27 }
 0x498   :  { %v539_v30 = vmul.f32 0.5, %v538_v29 }
 0x49a   :  { %541 = vst.msk [vmem:[#allocation9] sm:$0x1] %vm540_vm4, %v539_v30 }
 0x49b   :  { %839 = shalt.err (!%p836_p8)
}
 0x49c   :  { %s840_s12 = scalar_lea.hbm %s1058_s9, 16 }
 0x49d   :  { %p841_p9 = scmp.ne.s32.totalorder %s1058_s9, %s840_s12  ;;  %p844_p10 = scmp.lt.u32.totalorder %s840_s12, %s1058_s9 }
 0x49f   :  { %p846_p11 = pnand %p844_p10, %p841_p9 }
 0x4a1   :  { %849 = shalt.err (!%p846_p11)
}
 0x4a2   :  { %591 = dma.vmem_to_hbm [thread:$0]  %s589_s29, 16, %s1058_s9, [#allocation8]  }
 0x4a3   :  { %850 = dma.done.wait [#allocation3], 128  }
 0x4a4   :  { %851 = vsyncadd [#allocation3], 4294967168 }
 0x4a5   :  { %852 = dma.done.wait [#allocation5], 256  }
 0x4a6   :  { %853 = vsyncadd [#allocation5], 4294967040 }
 0x4a7   :  { %854 = dma.done.wait [#allocation8], 144  }
 0x4a8   :  { %855 = vsyncadd [#allocation8], 4294967152 }
 0x4a9   :  { %607 = vsyncpa [#allocation3], 1 }
 0x4aa   :  { %608 = vsyncpa [#allocation5], 1 }
 0x4ab   :  { %609 = vsyncpa [#allocation8], 1 }

</bundles_post_ra>
